<compile_context>
chip_gen: v6e
topology: v6e:2x2x1
jax: 0.10.0
libtpu: 0.0.40
codegen_flags: <defaults>
</compile_context>

<pallas_src>
import jax
import jax.numpy as jnp
import numpy as np
from jax.experimental import pallas as pl
from jax.experimental.pallas import tpu as pltpu


def _make_conv_kernel(Cin, K, Npix, W, kh, kw, pw, needs_mask):
    """Per-batch conv as one fused MXU contraction over an im2col VMEM slab."""
    taps = [(dh, dw) for dh in range(kh) for dw in range(kw)]

    def kernel(x_ref, w_ref, mask_ref, o_ref, xpad_ref, xst_ref):
        # x_ref   : (Cin, Npix)     flat H*W image, one batch element
        # w_ref   : (CoutR, K + 1)  packed weights, last column = bias
        # mask_ref: (kh*kw, Npix)   0/1 width-validity per tap
        # o_ref   : (CoutR, Npix)   flat conv output (lane-dense)
        # xpad_ref: (Cin, Wbuf)     zero-padded flat image (halo for the taps)
        # xst_ref : (K + 1, Npix)   stacked im2col patch (+ ones row for bias)

        # Build the halo'd flat image: zeros, then the image at lane offset pw.
        xpad_ref[...] = jnp.zeros_like(xpad_ref)
        xpad_ref[:, pl.ds(pw, Npix)] = x_ref[...]

        # Stack the kh*kw taps.  Each tap is a cheap lane-offset view of xpad,
        # multiplied by its precomputed width-boundary mask only when needed.
        for t, (dh, dw) in enumerate(taps):
            patch = xpad_ref[:, pl.ds(dh * W + dw, Npix)]
            if needs_mask[t]:
                patch = patch * mask_ref[pl.ds(t, 1), :]
            xst_ref[pl.ds(t * Cin, Cin), :] = patch

        # Constant-ones row folds the bias into the single contraction below.
        xst_ref[pl.ds(K, 1), :] = jnp.ones((1, Npix), dtype=xst_ref.dtype)

        # One fat MXU push: (CoutR, K+1) @ (K+1, Npix) with f32 accumulation.
        acc = jnp.dot(w_ref[...], xst_ref[...],
                      preferred_element_type=jnp.float32)
        o_ref[...] = acc.astype(o_ref.dtype)

    return kernel


def sp_conv_transpose_2d(x, weight, bias, kernel_size, padding_size, r):
    """x: (B, Cin, H, W) NCHW; weight: (Cout*r, Cin, kh, kw); bias: (Cout*r,)."""
    B, Cin, H, W = x.shape
    kh, kw = kernel_size
    CoutR = weight.shape[0]
    Cout = CoutR // r
    pw = padding_size

    H_out = H - kh + 1
    W_out = W + 2 * pw - kw + 1
    assert H_out >= 1 and W_out >= 1, "empty conv output"
    # Fast path is specialized to the width-preserving conv used by CAUNet
    # (2*padding == kw - 1, so W_out == W and every tap is a uniform lane
    # shift of the flattened image).
    # TODO(synk): general W_out != W configurations need a strided-row path.
    assert W_out == W, "sp_conv_transpose_2d requires 2*padding == kw - 1"

    Npix = H * W
    K = Cin * kh * kw
    Wbuf = Npix + (kh - 1) * W + (kw - 1)       # flat image + tap halo

    # Free reshape: flatten H*W onto the lane axis (no HBM pass, no jnp.pad).
    x_flat = x.reshape(B, Cin, Npix)

    # Pack weights as (CoutR, kh*kw*Cin) matching the in-kernel tap stacking,
    # and append the bias as an extra contraction column.
    w_core = jnp.transpose(weight, (0, 2, 3, 1)).reshape(CoutR, K)
    w_aug = jnp.concatenate([w_core, bias.reshape(CoutR, 1)], axis=1)

    # Static per-tap width-validity masks (handles the +/-pw padding in-kernel).
    col = np.arange(W)
    mask_rows, needs_mask = [], []
    for dh in range(kh):
        for dw in range(kw):
            row = (col >= pw - dw) & (col < W + pw - dw)
            needs_mask.append(bool(not row.all()))
            mask_rows.append(np.tile(row.astype(np.float32), H))
    tap_mask = jnp.asarray(np.stack(mask_rows), dtype=x.dtype)   # (kh*kw, Npix)

    kernel = _make_conv_kernel(Cin, K, Npix, W, kh, kw, pw, tuple(needs_mask))

    conv_flat = pl.pallas_call(
        kernel,
        out_shape=jax.ShapeDtypeStruct((B, CoutR, Npix), x.dtype),
        grid=(B,),
        in_specs=[
            pl.BlockSpec((None, Cin, Npix), lambda b: (b, 0, 0)),
            pl.BlockSpec((CoutR, K + 1), lambda b: (0, 0)),
            pl.BlockSpec((kh * kw, Npix), lambda b: (0, 0)),
        ],
        out_specs=pl.BlockSpec((None, CoutR, Npix), lambda b: (b, 0, 0)),
        scratch_shapes=[
            pltpu.VMEM((Cin, Wbuf), x.dtype),
            pltpu.VMEM((K + 1, Npix), x.dtype),
        ],
        compiler_params=pltpu.CompilerParams(
            dimension_semantics=("parallel",)),
    )(x_flat, w_aug, tap_mask)

    conv = conv_flat.reshape(B, CoutR, H, W)
    if kh > 1:
        conv = conv[:, :, :H_out, :]     # drop rows beyond the valid-H window

    # Sub-pixel shuffle along width.  Tiny XLA reshape/transpose of the output
    # (16 KB here, one HBM round trip).
    # TODO(synk): fuse the r-interleave into the kernel store once a
    # lane-interleave relayout is cheap/robust in Mosaic.
    out = conv.reshape(B, r, Cout, H_out, W_out)
    out = jnp.transpose(out, (0, 2, 3, 4, 1))
    return out.reshape(B, Cout, H_out, W_out * r)


def reference_sp_conv_transpose_2d(x, weight, bias, kernel_size, padding_size, r):
    """Pure-JAX reference mirroring the PyTorch module."""
    B, Cin, H, W = x.shape
    CoutR = weight.shape[0]
    Cout = CoutR // r
    conv = jax.lax.conv_general_dilated(
        x, weight, window_strides=(1, 1),
        padding=((0, 0), (padding_size, padding_size)),
        dimension_numbers=("NCHW", "OIHW", "NCHW"))
    conv = conv + bias.reshape(1, CoutR, 1, 1)
    _, _, H_out, W_out = conv.shape
    out = conv.reshape(B, r, Cout, H_out, W_out)
    out = jnp.transpose(out, (0, 2, 3, 4, 1))
    return out.reshape(B, Cout, H_out, W_out * r)


if __name__ == "__main__":
    # Module config (typical CAUNet usage): kernel (1,3), width padding 1, r=2.
    in_channels, out_channels = 4, 4
    kernel_size = (1, 3)
    padding_size = 1
    r = 2
    CoutR = out_channels * r

    B, H, W = 2, 16, 16

    key = jax.random.PRNGKey(0)
    kx, kw_, kb = jax.random.split(key, 3)

    # Deterministic Conv2d-style init (uniform +/- 1/sqrt(fan_in)).
    fan_in = in_channels * kernel_size[0] * kernel_size[1]
    bound = 1.0 / np.sqrt(fan_in)
    weight = jax.random.uniform(kw_, (CoutR, in_channels, *kernel_size),
                                jnp.float32, -bound, bound)
    bias = jax.random.uniform(kb, (CoutR,), jnp.float32, -bound, bound)
    x = jax.random.normal(kx, (B, in_channels, H, W), jnp.float32)

    out = sp_conv_transpose_2d(x, weight, bias, kernel_size, padding_size, r)
    out = jax.block_until_ready(out)

    ref = reference_sp_conv_transpose_2d(x, weight, bias, kernel_size,
                                         padding_size, r)
    np.testing.assert_allclose(np.asarray(out), np.asarray(ref),
                               rtol=1e-5, atol=1e-5)
    assert out.shape == (B, out_channels, H, W * r), out.shape

    print("KERNEL_OK")
</pallas_src>

<mosaic_0001>
module attributes {stable_mosaic.version = 11 : i64} {
  func.func @kernel(%arg0: i32, %arg1: memref<1x4x256xf32, #tpu.memory_space<vmem>>, %arg2: memref<8x13xf32, #tpu.memory_space<vmem>>, %arg3: memref<3x256xf32, #tpu.memory_space<vmem>>, %arg4: memref<1x8x256xf32, #tpu.memory_space<vmem>>, %arg5: memref<4x258xf32, #tpu.memory_space<vmem>>, %arg6: memref<13x256xf32, #tpu.memory_space<vmem>>) attributes {dimension_semantics = [#tpu.dimension_semantics<parallel>], iteration_bounds = array<i64: 2>, scalar_prefetch = 0 : i64, scratch_operands = 2 : i64, tpu.core_type = #tpu.core_type<tc>, window_params = [{transform_indices = @transform_0, window_bounds = array<i64: 1, 4, 256>}, {pipeline_mode = #tpu.pipeline_mode<synchronous>, transform_indices = @transform_1, window_bounds = array<i64: 8, 13>}, {pipeline_mode = #tpu.pipeline_mode<synchronous>, transform_indices = @transform_2, window_bounds = array<i64: 3, 256>}, {transform_indices = @transform_3, window_bounds = array<i64: 1, 8, 256>}]} {
    %cst = arith.constant 0.000000e+00 : f32
    %0 = vector.broadcast %cst : f32 to vector<4x258xf32>
    %c0 = arith.constant 0 : index
    %c0_0 = arith.constant 0 : index
    %1 = vector.load %arg5[%c0, %c0_0] : memref<4x258xf32, #tpu.memory_space<vmem>>, vector<4x258xf32>
    tpu.vector_store %arg5[%c0, %c0_0], %0 {strides = array<i32>} : memref<4x258xf32, #tpu.memory_space<vmem>>, vector<4x258xf32>,
    %c0_1 = arith.constant 0 : index
    %c0_2 = arith.constant 0 : index
    %c0_3 = arith.constant 0 : index
    %2 = vector.load %arg1[%c0_1, %c0_2, %c0_3] : memref<1x4x256xf32, #tpu.memory_space<vmem>>, vector<1x4x256xf32>
    %3 = vector.shape_cast %2 : vector<1x4x256xf32> to vector<4x256xf32>
    %c0_4 = arith.constant 0 : index
    %c1 = arith.constant 1 : index
    %4 = vector.load %arg5[%c0_4, %c1] : memref<4x258xf32, #tpu.memory_space<vmem>>, vector<4x256xf32>
    tpu.vector_store %arg5[%c0_4, %c1], %3 {strides = array<i32>} : memref<4x258xf32, #tpu.memory_space<vmem>>, vector<4x256xf32>,
    %c0_5 = arith.constant 0 : index
    %c0_6 = arith.constant 0 : index
    %5 = vector.load %arg5[%c0_5, %c0_6] : memref<4x258xf32, #tpu.memory_space<vmem>>, vector<4x256xf32>
    %c0_7 = arith.constant 0 : index
    %c0_8 = arith.constant 0 : index
    %6 = vector.load %arg3[%c0_7, %c0_8] : memref<3x256xf32, #tpu.memory_space<vmem>>, vector<1x256xf32>
    %7 = vector.broadcast %6 : vector<1x256xf32> to vector<4x256xf32>
    %8 = arith.mulf %5, %7 : vector<4x256xf32>
    %c0_9 = arith.constant 0 : index
    %c0_10 = arith.constant 0 : index
    %9 = vector.load %arg6[%c0_9, %c0_10] : memref<13x256xf32, #tpu.memory_space<vmem>>, vector<4x256xf32>
    tpu.vector_store %arg6[%c0_9, %c0_10], %8 {strides = array<i32>} : memref<13x256xf32, #tpu.memory_space<vmem>>, vector<4x256xf32>,
    %c0_11 = arith.constant 0 : index
    %c1_12 = arith.constant 1 : index
    %10 = vector.load %arg5[%c0_11, %c1_12] : memref<4x258xf32, #tpu.memory_space<vmem>>, vector<4x256xf32>
    %c4 = arith.constant 4 : index
    %c0_13 = arith.constant 0 : index
    %11 = vector.load %arg6[%c4, %c0_13] : memref<13x256xf32, #tpu.memory_space<vmem>>, vector<4x256xf32>
    tpu.vector_store %arg6[%c4, %c0_13], %10 {strides = array<i32>} : memref<13x256xf32, #tpu.memory_space<vmem>>, vector<4x256xf32>,
    %c0_14 = arith.constant 0 : index
    %c2 = arith.constant 2 : index
    %12 = vector.load %arg5[%c0_14, %c2] : memref<4x258xf32, #tpu.memory_space<vmem>>, vector<4x256xf32>
    %c2_15 = arith.constant 2 : index
    %c0_16 = arith.constant 0 : index
    %13 = vector.load %arg3[%c2_15, %c0_16] : memref<3x256xf32, #tpu.memory_space<vmem>>, vector<1x256xf32>
    %14 = vector.broadcast %13 : vector<1x256xf32> to vector<4x256xf32>
    %15 = arith.mulf %12, %14 : vector<4x256xf32>
    %c8 = arith.constant 8 : index
    %c0_17 = arith.constant 0 : index
    %16 = vector.load %arg6[%c8, %c0_17] : memref<13x256xf32, #tpu.memory_space<vmem>>, vector<4x256xf32>
    tpu.vector_store %arg6[%c8, %c0_17], %15 {strides = array<i32>} : memref<13x256xf32, #tpu.memory_space<vmem>>, vector<4x256xf32>,
    %cst_18 = arith.constant 1.000000e+00 : f32
    %17 = vector.broadcast %cst_18 : f32 to vector<1x256xf32>
    %c12 = arith.constant 12 : index
    %c0_19 = arith.constant 0 : index
    %18 = vector.load %arg6[%c12, %c0_19] : memref<13x256xf32, #tpu.memory_space<vmem>>, vector<1x256xf32>
    tpu.vector_store %arg6[%c12, %c0_19], %17 {strides = array<i32>} : memref<13x256xf32, #tpu.memory_space<vmem>>, vector<1x256xf32>,
    %c0_20 = arith.constant 0 : index
    %c0_21 = arith.constant 0 : index
    %19 = vector.load %arg2[%c0_20, %c0_21] : memref<8x13xf32, #tpu.memory_space<vmem>>, vector<8x13xf32>
    %c0_22 = arith.constant 0 : index
    %c0_23 = arith.constant 0 : index
    %20 = vector.load %arg6[%c0_22, %c0_23] : memref<13x256xf32, #tpu.memory_space<vmem>>, vector<13x256xf32>
    %cst_24 = arith.constant dense<0.000000e+00> : vector<8x256xf32>
    %21 = tpu.matmul %19, %20, %cst_24 {dimension_numbers = #tpu.dot_dimension_numbers<[1], [0], [0], [1], [0, 0, 1, 1], [], []>} : vector<8x13xf32>, vector<13x256xf32>, vector<8x256xf32> -> vector<8x256xf32>
    %c0_25 = arith.constant 0 : index
    %c0_26 = arith.constant 0 : index
    %c0_27 = arith.constant 0 : index
    %22 = vector.load %arg4[%c0_25, %c0_26, %c0_27] : memref<1x8x256xf32, #tpu.memory_space<vmem>>, vector<1x8x256xf32>
    %23 = vector.shape_cast %22 : vector<1x8x256xf32> to vector<8x256xf32>
    %24 = vector.shape_cast %21 : vector<8x256xf32> to vector<1x8x256xf32>
    tpu.vector_store %arg4[%c0_25, %c0_26, %c0_27], %24 {strides = array<i32>} : memref<1x8x256xf32, #tpu.memory_space<vmem>>, vector<1x8x256xf32>,
    return
  }
  func.func @transform_0(%arg0: i32) -> (i32, i32, i32) {
    %c0_i32 = arith.constant 0 : i32
    %c0_i32_0 = arith.constant 0 : i32
    %c0_i32_1 = arith.constant 0 : i32
    return %arg0, %c0_i32, %c0_i32_0 : i32, i32, i32
  }
  func.func @transform_1(%arg0: i32) -> (i32, i32) {
    %c0_i32 = arith.constant 0 : i32
    %c0_i32_0 = arith.constant 0 : i32
    %c0_i32_1 = arith.constant 0 : i32
    return %c0_i32, %c0_i32_0 : i32, i32
  }
  func.func @transform_2(%arg0: i32) -> (i32, i32) {
    %c0_i32 = arith.constant 0 : i32
    %c0_i32_0 = arith.constant 0 : i32
    %c0_i32_1 = arith.constant 0 : i32
    return %c0_i32, %c0_i32_0 : i32, i32
  }
  func.func @transform_3(%arg0: i32) -> (i32, i32, i32) {
    %c0_i32 = arith.constant 0 : i32
    %c0_i32_0 = arith.constant 0 : i32
    %c0_i32_1 = arith.constant 0 : i32
    return %arg0, %c0_i32, %c0_i32_0 : i32, i32, i32
  }
}

</mosaic_0001>

<bundles_post_ra>
// kernel: tpu_custom_call.1
= control target key start
LH: loop header
LB: loop body
LE: loop exit
PB: predicated region body
PF: predicated region fallthrough
CT: control target
= control target key end

     0   :  { %8 = vsyncpa [#allocation5], 0  ;;  %s957_s0 = inlined_call_operand.hbm [shape: f32[2,4,256], index: 0, kind: input, shape index: {}]   ;;  %s958_s1 = inlined_call_operand.hbm [shape: f32[8,13], index: 1, kind: input, shape index: {}]   ;;  %s959_s2 = inlined_call_operand.hbm [shape: f32[3,256], index: 2, kind: input, shape index: {}]   ;;  %s960_s3 = inlined_call_operand.hbm [shape: f32[2,8,256], index: 3, kind: output, shape index: {}]  }
   0x1   :  { %10 = vsyncpa [#allocation5 + $0x1], 0 }
   0x2   :  { %11 = vsyncpa [#allocation8], 0 }
   0x3   :  { %12 = vsyncpa [#allocation6], 0 }
   0x4   :  { %14 = vsyncpa [#allocation6 + $0x1], 0  ;;  %s785_s12 = smov 0   ;;  %s787_s13 = smov 0  }
   0x5   :  { %s789_s14 = smov 0   ;;  %s791_s15 = smov 0  }
   0x6 LB: > { %s806_s16 = sadd.s32 4294967295, %s753_s15   ;;  %s507_s17 = sadd.s32 4294967294, %s753_s15   ;;  %s753_s15 = sphi %s791_s15, %s982_s15   ;;  %s749_s14 = sphi %s789_s14, %s981_s14   ;;  %s745_s13 = sphi %s787_s13, %s980_s13   ;;  %s741_s12 = sphi %s785_s12, %s979_s12  }
   0x7   : > { %p40_p0 = scmp.ne.s32.totalorder %s745_s13, %s741_s12  ;;  %p961_p1 = scmp.eq.s32.totalorder %s806_s16, 0 }
   0x8   : > { %p112_p3 = scmp.eq.s32.totalorder %s507_s17, 1  ;;  %p508_p5 = scmp.ge.s32.totalorder %s753_s15, 1 }
   0x9   : > { %p815_p4 = por %p961_p1, %p40_p0  ;;  %p119_p7 = scmp.lt.s32.totalorder %s753_s15, 3 }
   0xa   : > { %p820_p6 = por %p112_p3, %p40_p0  ;;  %s755_s21 = smov [#allocation7]  }
   0xb   : > { %s965_s18 = scalar_select %p815_p4, 1, 0 }
   0xc   : > { %s966_s19 = scalar_select %p820_p6, 1, 0 }
   0xd   : > { %p825_p8 = pnand %p508_p5, %p119_p7  ;;  %s132_s22 = sshll.u32 %s755_s21, 4  ;;  %s133_s22 = int_to_ptr.vmem [resolvable:$true] %s132_s22 }
   0xe   : > { %s756_s23 = smov [#allocation9]   ;;  %s839_s26 = sadd.s32 1, %s753_s15  }
   0xf   : > { %s967_s20 = scalar_select %p825_p8, 1, 0 }
  0x10   : > { %p542_p10 = pneg %p825_p8  ;;  %s143_s24 = sshll.u32 %s756_s23, 4  ;;  %s144_s24 = int_to_ptr.vmem [resolvable:$true] %s143_s24 }
  0x11   : > { %s24_s27 = ssub.s32 %s753_s15, %s839_s26  ;;  %s616_s28 = scalar_lea.vmem %s133_s22, 128 }
  0x12   : > { %p834_p11 = pnand %p542_p10, %p961_p1  ;;  %p617_p13 = scmp.ne.s32.totalorder %s133_s22, %s616_s28 }
  0x13   : > { %p624_p5 = scmp.lt.s32.totalorder %s133_s22, %s133_s22  ;;  %p625_p7 = scmp.lt.s32.totalorder %s616_s28, %s616_s28 }
  0x14   : > { %p607_p12 = pneg %p834_p11 }
  0x15   : > { %p626_p10 = por %p625_p7, %p624_p5 }
  0x16   : > { %p619_p0 = pnand %p617_p13, %p607_p12 }
  0x18   : > { %p620_p3 = pneg %p619_p0 }
  0x1a   : > { %p627_p9 = pnand %p626_p10, %p620_p3 }
  0x1c   : > { %630 = shalt.err (!%p627_p9)
}
  0x1d   : > { %545 = dma.hbm_to_vmem [thread:$0]  (!%p834_p11), %s958_s1, 128, %s133_s22, [#allocation8]  }
  0x1e   : > { %s642_s4 = scalar_lea.vmem %s144_s24, 128  ;;  %p650_p13 = scmp.lt.s32.totalorder %s144_s24, %s144_s24 }
  0x1f   : > { %p643_p1 = scmp.ne.s32.totalorder %s144_s24, %s642_s4  ;;  %p651_p0 = scmp.lt.s32.totalorder %s642_s4, %s642_s4 }
  0x21   : > { %p645_p2 = pnand %p643_p1, %p607_p12  ;;  %p652_p4 = por %p651_p0, %p650_p13 }
  0x23   : > { %p646_p6 = pneg %p645_p2 }
  0x25   : > { %p653_p8 = pnand %p652_p4, %p646_p6 }
  0x27   : > { %656 = shalt.err (!%p653_p8)
}
  0x28   : > { %548 = dma.hbm_to_vmem [thread:$0]  (!%p834_p11), %s959_s2, 128, %s144_s24, [#allocation8]  }
  0x29   : > { %p25_p1 = scmp.eq.s32.totalorder %s24_s27, 0  ;;  %s27_s7 = sadd.s32 1, %s749_s14 }
  0x2a   : > { %p34_p2 = scmp.ne.s32.totalorder %s749_s14, %s745_s13  ;;  %p35_p4 = scmp.eq.s32.totalorder %s753_s15, 0 }
  0x2b   : > { %s866_s8 = scalar_select %p25_p1, %s749_s14, %s27_s7  }
  0x2c   : > { %p36_p6 = por %p35_p4, %p34_p2  ;;  %p969_p8 = scmp.eq.s32.totalorder %s806_s16, 1 }
  0x2d   : > { %p559_p12 = scmp.lt.s32.totalorder %s753_s15, 2  ;;  %s154_s10 = sand.u32 1, %s749_s14  }
  0x2e   : > { %p870_p9 = por %p969_p8, %p34_p2  ;;  %s512_s11 = sshll.u32 %s154_s10, 3 }
  0x2f   : > { %s528_s17 = sshll.u32 %s753_s15, 7  ;;  %s158_s24 = scalar_lea.vmem [#allocation4], %s512_s11 }
  0x30   : > { %s970_s9 = scalar_select %p870_p9, 1, 0 }
  0x31   : > { %s880_s23 = scalar_lea.hbm %s957_s0, %s528_s17  ;;  %s166_s25 = sshll.u32 %s158_s24, 4  ;;  %s167_s25 = int_to_ptr.vmem [resolvable:$true] %s166_s25 }
  0x32   : > { %p882_p11 = pnand %p559_p12, %p36_p6  ;;  %s155_s28 = scalar_lea.sflag [#allocation5], %s154_s10 }
  0x33   : > { %s657_s29 = scalar_lea.hbm %s880_s23, 128  ;;  %s662_s5 = scalar_lea.hbm %s957_s0, 256 }
  0x34   : > { %p658_p3 = scmp.ne.s32.totalorder %s880_s23, %s657_s29  ;;  %p659_p5 = pneg %p882_p11 }
  0x35   : > { %p663_p13 = scmp.lt.s32.totalorder %s880_s23, %s957_s0  ;;  %p664_p0 = scmp.lt.s32.totalorder %s662_s5, %s657_s29 }
  0x36   : > { %p660_p7 = pnand %p659_p5, %p658_p3 }
  0x37   : > { %p665_p1 = por %p664_p0, %p663_p13 }
  0x38   : > { %p661_p10 = pneg %p660_p7 }
  0x3a   : > { %p666_p2 = pnand %p665_p1, %p661_p10 }
  0x3c   : > { %669 = shalt.err (!%p666_p2)
}
  0x3d   : > { %s670_s11 = scalar_lea.vmem %s167_s25, 128  ;;  %s757_s10 = smov [#allocation4]  }
  0x3e   : > { %p671_p4 = scmp.ne.s32.totalorder %s167_s25, %s670_s11  ;;  %s675_s17 = sshll.u32 %s757_s10, 4  ;;  %s676_s17 = int_to_ptr.vmem [resolvable:$false] %s675_s17 }
  0x3f   : > { %s677_s21 = scalar_lea.vmem %s676_s17, 256  ;;  %p678_p12 = scmp.lt.s32.totalorder %s167_s25, %s676_s17 }
  0x40   : > { %p673_p6 = pnand %p671_p4, %p659_p5  ;;  %p679_p3 = scmp.lt.s32.totalorder %s677_s21, %s670_s11 }
  0x42   : > { %p674_p8 = pneg %p673_p6  ;;  %p680_p7 = por %p679_p3, %p678_p12 }
  0x44   : > { %p681_p9 = pnand %p680_p7, %p674_p8 }
  0x46   : > { %684 = shalt.err (!%p681_p9)
}
  0x47   : > { %552 = dma.hbm_to_vmem [thread:$0]  (!%p882_p11), %s880_s23, 128, %s167_s25, %s155_s28  }
  0x48   : > { %p972_p10 = scmp.ne.s32.totalorder %s967_s20, 0 }
  0x49   : > { %s903_s22 = sand.u32 (!%p972_p10), 1, %s745_s13   ;;  %p973_p5 = scmp.ne.s32.totalorder (!%p972_p10), %s965_s18, 0 }
  0x4a   : > { %175 = sbr.rel (%p972_p10) target bundleno = 555 (0x22b), region = 32  ;;  %s516_s24 = sshll.u32 (!%p972_p10), %s903_s22, 3 }
  0x4b   : > { %s178_s29 = scalar_lea.sflag (!%p972_p10), [#allocation5], %s903_s22  ;;  %s181_s30 = scalar_lea.vmem (!%p972_p10), [#allocation4], %s516_s24 }
  0x4f   : > { %728 = dma.done.wait (%p973_p5), %s178_s29, 128  }
  0x50   : > { %730 = vsyncadd (%p973_p5), %s178_s29, 4294967168  ;;  %p974_p9 = scmp.eq.s32.totalorder %s806_s16, 0 }
  0x52   : > { %732 = dma.done.wait (%p974_p9), [#allocation8], 256   ;;  %p975_p11 = pmov %p974_p9 }
  0x53   : > { %v233_v0 = vlaneseq  ;;  %vm213_vm0 = vcmask 11264   ;;  %v758_v1 = vmov 0.0   ;;  %v759_v3 = vmov 1.0   ;;  %v215_v6 = vld [vmem:[%s181_s30] sm:$0xff]  ;;  %s760_s18 = smov 1   ;;  %s761_s20 = smov 2  }
  0x54   : > { %734 = vsyncadd (%p975_p11), [#allocation8], 4294967040  ;;  %212 = vst [vmem:[#allocation2] sm:$0xff] %v758_v1  ;;  %394 = vmatprep.mubr.f32.mxu0 %v758_v1  ;;  %v231_v7 = vld [vmem:[#allocation9] ss:$4 sm:$0x3]  ;;  %217 = vrot.lane.b32.xlu0 %v215_v6, %s760_s18 }
  0x55   : > { %v234_v2 = vshrl.u32 %v233_v0, 7  ;;  %vm309_vm1 = vcmp.lt.s32.totalorder %v233_v0, 256  ;;  %214 = vst.msk [vmem:[#allocation2 + $0x8] sm:$0xf] %vm213_vm0, %v758_v1  ;;  %vm224_vm2 = vcmask 1043464   ;;  %vm225_vm3 = vcmask 1047556  }
  0x56   : > { %312 = vst.msk [vmem:[#allocation3 + $0x14] ss:$8 sm:$0x3] %vm309_vm1, %v759_v3  ;;  %v271_v10 = vld [vmem:[#allocation9 + $0x2] ss:$4 sm:$0x3]  ;;  %vm226_vm6 = vmor %vm225_vm3, %vm224_vm2 }
  0x57   : > { %v235_v4 = vsub.s32 0, %v234_v2  ;;  %v239_v5 = vsub.s32 1, %v234_v2  ;;  %vm220_vm4 = vcmask 7168   ;;  %vm228_vm5 = vcmask 3072   ;;  %s762_s23 = smov 127   ;;  %s763_s25 = smov 126  }
  0x58   : > { %vm285_vm7 = vcmask 15360   ;;  %vm261_vm8 = vcmask 1039360   ;;  %vm300_vm9 = vcmask 1031168   ;;  %vm323_vm10 = vcmask 1044480   ;;  %v314_v43 = vld [vmem:[#allocation7] sm:$0xff]  ;;  %s519_s27 = sshll.u32 %s903_s22, 4 }
  0x59   : > { %v236_v8 = vrot.slane %v231_v7, %v235_v4  ;;  %v240_v9 = vrot.slane %v231_v7, %v239_v5  ;;  %v276_v11 = vrot.slane %v271_v10, %v235_v4  ;;  %v280_v12 = vrot.slane %v271_v10, %v239_v5  ;;  %s211_s28 = scalar_lea.vmem [#allocation10], %s519_s27  ;;  %s529_s5 = sshll.u32 %s806_s16, 8 }
  0x5a   : > { %vm319_vm11 = vcmask 105472   ;;  %s418_s4 = sshll.u32 %s211_s28, 4  ;;  %s416_s11 = scalar_lea.hbm %s960_s3, %s529_s5  ;;  %s917_s4 = int_to_ptr.vmem [resolvable:$true] %s418_s4 }
  0x5b   : > { %v241_v13 = vcombine.low %v236_v8, %v240_v9  ;;  %v281_v14 = vcombine.low %v276_v11, %v280_v12  ;;  %s404_s10 = scalar_lea.sflag [#allocation6], %s903_s22  ;;  %s685_s17 = scalar_lea.vmem %s917_s4, 256 }
  0x5c   : > { %p686_p13 = scmp.ne.s32.totalorder %s917_s4, %s685_s17  ;;  %p976_p0 = scmp.ne.s32.totalorder %s970_s9, 0 }
  0x5d   : > { %282 = vrot.lane.b32.xlu0 %v281_v14, %s761_s20  ;;  %s764_s16 = smov [#allocation10]  }
  0x5e   : > { %p687_p1 = pnand %p686_p13, %p976_p0  ;;  %s689_s21 = sshll.u32 %s764_s16, 4  ;;  %s690_s21 = int_to_ptr.vmem [resolvable:$false] %s689_s21 }
  0x5f   : > { %s691_s24 = scalar_lea.vmem %s690_s21, 512  ;;  %p692_p4 = scmp.lt.s32.totalorder %s917_s4, %s690_s21 }
  0x60   : > { %p688_p2 = pneg %p687_p1  ;;  %p693_p6 = scmp.lt.s32.totalorder %s691_s24, %s685_s17 }
  0x62   : > { %p694_p8 = por %p693_p6, %p692_p4 }
  0x64   : > { %p695_p12 = pnand %p694_p8, %p688_p2 }
  0xc6   : > { %v218_v15 = vpop.permute.xlu0 %217 }
  0xc7   : > { %v219_v16 = vrot.slane %v218_v15, 4 }
  0xc9   : > { %v221_v17 = vsel %vm220_vm4, %v219_v16, %v218_v15  ;;  %229 = vst.msk [vmem:[#allocation2 + $0x8] sm:$0xf] %vm228_vm5, %v219_v16 }
  0xca   : > { %227 = vst.msk [vmem:[#allocation2] sm:$0xff] %vm226_vm6, %v221_v17 }
  0xcf   : > { %v283_v18 = vpop.permute.xlu0 %282 }
  0xd0   : > { %v284_v19 = vrot.slane %v283_v18, 4  ;;  %v269_v22 = vld [vmem:[#allocation2 + $0x8] sm:$0xf] }
  0xd1   : > { %v230_v21 = vld [vmem:[#allocation2] sm:$0xff]  ;;  %v604_v27 = vld [vmem:[#allocation2 + $0x8] ss:$0 sps:$4 sm:$0xff]  }
  0xd2   : > { %v286_v20 = vsel %vm285_vm7, %v284_v19, %v283_v18  ;;  %257 = vrot.lane.b32.xlu1 %v230_v21, %s762_s23  ;;  %v243_v24 = vmul.f32 %v241_v13, %v230_v21  ;;  %v290_v25 = vmul.f32 %v284_v19, %v269_v22  ;;  %v253_v29 = vcombine.low %v230_v21, %v230_v21 }
  0xd3   : > { %v289_v23 = vmul.f32 %v286_v20, %v230_v21 }
  0xd4   : > { %v245_v26 = vcombine.high %v243_v24, %v243_v24  ;;  %247 = vst [vmem:[#allocation3] sm:$0xf] %v243_v24 }
  0xd5   : > { %294 = vrot.lane.b32.xlu0 %v289_v23, %s763_s25  ;;  %v293_v28 = vcombine.high %v289_v23, %v289_v23 }
  0xd6   : > { %298 = vrot.lane.b32.xlu1 %v290_v25, %s763_s25  ;;  %248 = vst [vmem:[#allocation3 + $0x8] sm:$0xf] %v245_v26 }
  0xd9   : > { %259 = vrot.lane.b32.xlu0 %v604_v27, %s762_s23 }
  0xda   : > { %296 = vrot.lane.b32.xlu1 %v293_v28, %s763_s25 }
  0xde   : > { %255 = vrot.lane.b32.xlu1 %v253_v29, %s762_s23 }
 0x144   : > { %v258_v30 = vpop.permute.xlu1 %257 }
 0x147   : > { %v295_v31 = vpop.permute.xlu0 %294 }
 0x148   : > { %v299_v32 = vpop.permute.xlu1 %298 }
 0x14b   : > { %v260_v33 = vpop.permute.xlu0 %259 }
 0x14c   : > { %v263_v34 = vsel %vm261_vm8, %v258_v30, %v260_v33  ;;  %v297_v35 = vpop.permute.xlu1 %296 }
 0x14d   : > { %267 = vst [vmem:[#allocation3 + $0x8] sm:$0xf0] %v263_v34  ;;  %v301_v36 = vsel %vm300_vm9, %v295_v31, %v297_v35  ;;  %v302_v37 = vsel %vm300_vm9, %v297_v35, %v299_v32 }
 0x14e   : > { %305 = vst [vmem:[#allocation3 + $0x10] sm:$0xf] %v301_v36  ;;  %306 = vst [vmem:[#allocation3 + $0x18] sm:$0xf] %v302_v37 }
 0x150   : > { %v256_v38 = vpop.permute.xlu1 %255 }
 0x151   : > { %v262_v39 = vsel %vm261_vm8, %v256_v38, %v258_v30 }
 0x152   : > { %266 = vst [vmem:[#allocation3] sm:$0xf0] %v262_v39 }
 0x154   : > { %v316_v42 = vld [vmem:[#allocation3 + $0x8] sm:$0xff] }
 0x155   : > { %v318_v40 = vld [vmem:[#allocation3 + $0x18] sm:$0x1f]  ;;  %v317_v41 = vld [vmem:[#allocation3 + $0x10] sm:$0x1f] }
 0x156   : > { %520 = vmatprep.subr.msk.mxu0 %vm323_vm10, %v318_v40 }
 0x157   : > { %521 = vmatpush1.msk.msra.mxu0 %vm323_vm10, %v317_v41 }
 0x158   : > { %360 = vmatprep.subr.mxu0 %v316_v42 }
 0x159   : > { %v315_v44 = vld [vmem:[#allocation3] sm:$0xff] }
 0x15a   : > { %361 = vmatpush1.msra.mxu0 %v315_v44 }
 0x15b   : > { %522 = vmatmul.mubr.msk.f32.vlgmr.msra.gmra.mxu0 %vm319_vm11, %v314_v43 }
 0x21b   : > { %v396_v45 = vpop.f32.mrf.mxu0 }
 0x21c   : > { %401 = vst [vmem:[%s211_s28] sm:$0xff] %v396_v45 }
 0x21d   : > { %v398_v46 = vpop.f32.mrf.mxu0 }
 0x21e   : > { %402 = vst [vmem:[%s211_s28 + $0x8] sm:$0xff] %v398_v46 }
 0x21f   : > { %698 = shalt.err (!%p695_p12)
}
 0x220   : > { %s699_s29 = scalar_lea.hbm %s416_s11, 256  ;;  %s703_s18 = scalar_lea.hbm %s960_s3, 512 }
 0x221   : > { %p700_p3 = scmp.ne.s32.totalorder %s416_s11, %s699_s29  ;;  %p704_p5 = scmp.lt.s32.totalorder %s416_s11, %s960_s3 }
 0x222   : > { %p705_p9 = scmp.lt.s32.totalorder %s703_s18, %s699_s29 }
 0x223   : > { %p701_p7 = pnand %p700_p3, %p976_p0 }
 0x224   : > { %p706_p11 = por %p705_p9, %p704_p5 }
 0x225   : > { %p702_p10 = pneg %p701_p7 }
 0x227   : > { %p707_p13 = pnand %p706_p11, %p702_p10 }
 0x229   : > { %710 = shalt.err (!%p707_p13)
}
 0x22a   : > { %540 = dma.vmem_to_hbm [thread:$0]  (%p976_p0), %s917_s4, 256, %s416_s11, %s404_s10  }
 0x22b PF: > { %s430_s25 = sand.u32 1, %s741_s12   ;;  %p977_p1 = scmp.ne.s32.totalorder %s966_s19, 0 }
 0x22c   : > { %p978_p2 = scmp.ge.s32.totalorder %s753_s15, 2  ;;  %s431_s27 = scalar_lea.sflag [#allocation6], %s430_s25 }
 0x22e   : > { %p554_p4 = pnand %p978_p2, %p977_p1 }
 0x230   : > { %p555_p6 = pneg %p554_p4 }
 0x232   : > { %736 = dma.done.wait (%p555_p6), %s431_s27, 256  }
 0x233   : > { %738 = vsyncadd (%p555_p6), %s431_s27, 4294967040  ;;  %p17_p8 = scmp.ge.s32.totalorder %s839_s26, 4   ;;  %s979_s12 = smov %s745_s13 }
 0x234   : > { %s980_s13 = smov %s749_s14  ;;  %s981_s14 = smov %s866_s8 }
 0x235   : > { %s982_s15 = smov %s839_s26  ;;  %19 = sbr.rel (!%p17_p8) target bundleno = 6 (0x6), region = 87 }
 0x23a   :  { %436 = vsyncpa [#allocation5], 1 }
 0x23b   :  { %438 = vsyncpa [#allocation5 + $0x1], 1 }
 0x23c   :  { %439 = vsyncpa [#allocation8], 1 }
 0x23d   :  { %440 = vsyncpa [#allocation6], 1 }
 0x23e   :  { %442 = vsyncpa [#allocation6 + $0x1], 1 }

</bundles_post_ra>
